<compile_context>
chip_gen: v7x
topology: tpu7x:2x2x1
jax: 0.10.0
libtpu: 0.0.40
codegen_flags: <defaults>
</compile_context>

<pallas_src>
import math
from collections import UserDict

import jax
import jax.numpy as jnp
import numpy as np
from jax.experimental import pallas as pl
from jax.experimental.pallas import tpu as pltpu


_SMALL_BYTES = 256 * 1024          # below this: hold the immutable array, no kernel dispatch
_MIN_STRIPE_BYTES = 256 * 1024     # each concurrent DMA stripe at least this big
_MAX_STRIPES = 8                   # max concurrent HBM->HBM DMA descriptors
_STRIPE_ALIGN_ELEMS = 1024         # stripe boundaries aligned to this many elements
_MAX_LANES = 16 * 1024             # cap on lane-dense width (tiled fallback)

_copy_fn_cache = {}


# ----------------------------------------------------------------------------
# Generation-aware tiling parameters (v5e: 4 MiB blocks; v6e/v7x: 8 MiB blocks;
# vmem_limit respects v7x's 64 MiB physical / 32 MiB scoped VMEM per TC).
# ----------------------------------------------------------------------------
def _tpu_block_params():
    try:
        kind = jax.devices()[0].device_kind.lower()
    except Exception:
        kind = ""
    if "v7" in kind:
        return 8 << 20, 48 << 20   # 2 arrays x 2 bufs x 8 MiB = 32 MiB; 64 MiB physical per TC
    if "v6" in kind:
        return 8 << 20, 64 << 20   # 128 MiB physical VMEM; headroom is free
    return 4 << 20, 32 << 20       # v5e / older / unknown: 4 MiB already ~85% of HBM roofline


_TARGET_BLOCK_BYTES, _VMEM_LIMIT_BYTES = _tpu_block_params()
_MAX_BLOCK_BYTES = 2 * _TARGET_BLOCK_BYTES


# ----------------------------------------------------------------------------
# Strategy 1: striped whole-array HBM->HBM DMA (no VMEM staging, no grid loop).
# ----------------------------------------------------------------------------
def _stripe_bounds(n_elems, itemsize):
    nbytes = n_elems * itemsize
    n_stripes = int(min(_MAX_STRIPES, max(1, nbytes // _MIN_STRIPE_BYTES)))
    if n_stripes > 1:
        base = (n_elems // n_stripes) // _STRIPE_ALIGN_ELEMS * _STRIPE_ALIGN_ELEMS
        if base == 0:
            n_stripes = 1
    if n_stripes == 1:
        return [(0, n_elems)]
    bounds = []
    start = 0
    for _ in range(n_stripes - 1):
        bounds.append((start, start + base))
        start += base
    bounds.append((start, n_elems))
    return bounds


def _build_striped_dma_copy(shape, dtype):
    dtype = np.dtype(dtype)
    n = math.prod(shape)
    nbytes = n * dtype.itemsize
    bounds = _stripe_bounds(n, dtype.itemsize)
    n_stripes = len(bounds)

    def kernel(x_ref, o_ref, sems):
        # Issue all stripe DMAs first (concurrent descriptors), then wait them all.
        copies = []
        for i, (s, e) in enumerate(bounds):            # static Python unroll
            cp = pltpu.make_async_copy(x_ref.at[s:e], o_ref.at[s:e], sems.at[i])
            cp.start()
            copies.append(cp)
        for cp in copies:
            cp.wait()

    copy = pl.pallas_call(
        kernel,
        out_shape=jax.ShapeDtypeStruct((n,), dtype),
        in_specs=[pl.BlockSpec(memory_space=pl.ANY)],
        out_specs=pl.BlockSpec(memory_space=pl.ANY),
        scratch_shapes=[pltpu.SemaphoreType.DMA((n_stripes,))],   # instantiated spec
        cost_estimate=pl.CostEstimate(
            flops=0, transcendentals=0, bytes_accessed=2 * nbytes),
    )

    def fn(arr):
        # reshape / reshape-back are metadata-only under jit.
        return copy(arr.reshape(n)).reshape(shape)

    return jax.jit(fn)


# ----------------------------------------------------------------------------
# Strategy 2: tiled, lane-dense VMEM copy (fallback).
# ----------------------------------------------------------------------------
def _tiled_copy_kernel(x_ref, o_ref):
    o_ref[...] = x_ref[...]


def _lane_dense_2d(n_elems):
    """Factor the flat element count into (rows, cols) with cols a large multiple
    of 128 so every store is an unmasked full-lane vst.  Non-128-divisible sizes
    return None (the DMA path / XLA copy handle those; no 1-sublane fallback)."""
    if n_elems % 128 != 0:
        return None
    max_mult = min(_MAX_LANES // 128, n_elems // 128)
    for m in range(max_mult, 0, -1):
        if n_elems % (128 * m) == 0:
            cols = 128 * m
            return n_elems // cols, cols
    return None


def _row_tile(rows, cols, itemsize, target_bytes):
    """Largest row tile near target_bytes that respects dtype sublane packing
    (8 f32 / 16 bf16 / 32 int8) and divides `rows` exactly (no edge masking)."""
    sub = max(8, 32 // itemsize)
    max_tr = max(sub, (target_bytes // max(1, cols * itemsize)) // sub * sub)
    if rows <= max_tr:
        return rows                        # whole array in one block (full extent)
    t = max_tr
    while t >= sub:
        if rows % t == 0:
            return t
        t -= sub
    return rows                            # no clean divisor (rare); single block


def _build_tiled_copy(shape, dtype, target_block_bytes=None):
    dtype = np.dtype(dtype)
    itemsize = dtype.itemsize
    n = math.prod(shape)
    rc = _lane_dense_2d(n)
    if rc is None:
        return None                        # not 128-divisible; caller falls back
    rows, cols = rc
    tb = target_block_bytes or _TARGET_BLOCK_BYTES
    tr = _row_tile(rows, cols, itemsize, tb)
    if rows % tr != 0:
        tr = rows
    if tr * cols * itemsize > _MAX_BLOCK_BYTES:
        return None                        # pathological shape; caller falls back
    grid = (rows // tr,)
    nbytes = n * itemsize

    copy = pl.pallas_call(
        _tiled_copy_kernel,
        out_shape=jax.ShapeDtypeStruct((rows, cols), dtype),
        grid_spec=pltpu.PrefetchScalarGridSpec(
            num_scalar_prefetch=0,
            grid=grid,
            in_specs=[pl.BlockSpec((tr, cols), lambda i: (i, 0))],
            out_specs=pl.BlockSpec((tr, cols), lambda i: (i, 0)),
        ),
        compiler_params=pltpu.CompilerParams(
            dimension_semantics=("parallel",),   # independent tiles; 2-TC split on v7x
            vmem_limit_bytes=_VMEM_LIMIT_BYTES,
        ),
        cost_estimate=pl.CostEstimate(
            flops=0, transcendentals=0, bytes_accessed=2 * nbytes),
    )

    def fn(arr):
        return copy(arr.reshape(rows, cols)).reshape(shape)

    return jax.jit(fn)


# ----------------------------------------------------------------------------
# Per-(shape, dtype) strategy selection with a one-time correctness probe.
# ----------------------------------------------------------------------------
def _probe_equal(a, b):
    if jnp.issubdtype(a.dtype, jnp.inexact):
        return bool(jnp.array_equal(a, b, equal_nan=True))
    return bool(jnp.array_equal(a, b))


def _pallas_copy(arr):
    key = (arr.shape, arr.dtype)
    fn = _copy_fn_cache.get(key)
    if fn is not None:
        return fn(arr)

    builders = (
        lambda: _build_striped_dma_copy(arr.shape, arr.dtype),
        lambda: _build_tiled_copy(arr.shape, arr.dtype),
    )
    for build in builders:
        try:
            cand = build()
            if cand is None:
                continue
            out = cand(arr)
            jax.block_until_ready(out)       # surface compile/runtime failures (one-time probe)
            if not _probe_equal(out, arr):   # must be a faithful snapshot
                continue
            _copy_fn_cache[key] = cand
            return out
        except Exception:
            continue

    # Last resort: plain XLA copy (still a snapshot; never aliased to the input).
    fn = jax.jit(lambda a: jnp.copy(a))
    _copy_fn_cache[key] = fn
    return fn(arr)


def pallas_capture(x):
    """Capture one input.  Large device arrays are snapshotted via the Pallas
    copy kernel; small arrays are kept as-is (immutable arrays already ARE a
    snapshot, and kernel dispatch would be pure overhead); non-array leaves
    pass through unchanged, mirroring the PyTorch module."""
    if not isinstance(x, jax.Array):
        return x
    if x.size == 0 or x.size * x.dtype.itemsize < _SMALL_BYTES:
        return x
    return _pallas_copy(x)


# ----------------------------------------------------------------------------
# InputCaptureModule equivalent.
# ----------------------------------------------------------------------------
class InputCaptureModule:
    """JAX/Pallas analogue of neural_compressor's InputCaptureModule.

    forward(*args, **kwargs) captures the inputs (device arrays snapshotted via
    the Pallas copy kernels) into args_list / kwargs_list and returns None,
    matching the PyTorch module."""

    def __init__(self, model=None) -> None:
        self.args_list = []
        self.kwargs_list = []
        self.orig_model = model            # held but never invoked, same as reference

    def _capture_tree(self, obj):
        if isinstance(obj, (list, tuple)):
            return type(obj)(self._capture_tree(o) for o in obj)
        if isinstance(obj, (dict, UserDict)):
            return {k: self._capture_tree(v) for k, v in obj.items()}
        return pallas_capture(obj)

    def forward(self, *args, **kwargs):
        # TODO(synk): torch.no_grad() and the Python-list append side effects have
        # no Pallas equivalent; the capture itself is pure data movement (kernel).
        self.args_list.append(tuple(self._capture_tree(a) for a in args))
        self.kwargs_list.append({k: self._capture_tree(v) for k, v in kwargs.items()})
        return None                        # PyTorch forward implicitly returns None

    __call__ = forward


# ----------------------------------------------------------------------------
# Demo / smoke test.
# ----------------------------------------------------------------------------
if __name__ == "__main__":
    key = jax.random.PRNGKey(0)
    k1, k2, k3, k4, k5 = jax.random.split(key, 5)

    # Small inputs consistent with a typical calibration forward (bypass path).
    x = jax.random.normal(k1, (2, 4, 16, 16), dtype=jnp.float32)       # NCHW activation
    ids = jax.random.randint(k2, (2, 8), 0, 32, dtype=jnp.int32)       # token ids
    mask = (jax.random.uniform(k3, (2, 8)) > 0.5).astype(jnp.float32)  # attention mask
    hidden = jax.random.normal(k4, (2, 8, 32), dtype=jnp.float32)      # (B, S, H)

    capture = InputCaptureModule(model=None)
    out = capture(x, ids, attention_mask=mask, hidden_states=hidden)
    assert out is None                     # forward returns None, like the PyTorch module

    cap_args = capture.args_list[0]
    cap_kwargs = capture.kwargs_list[0]
    jax.block_until_ready(cap_args)
    jax.block_until_ready(tuple(cap_kwargs.values()))

    assert len(capture.args_list) == 1 and len(capture.kwargs_list) == 1
    assert cap_args[0].shape == x.shape and cap_args[0].dtype == x.dtype
    assert jnp.array_equal(cap_args[0], x)
    assert jnp.array_equal(cap_args[1], ids)
    assert jnp.array_equal(cap_kwargs["attention_mask"], mask)
    assert jnp.array_equal(cap_kwargs["hidden_states"], hidden)

    # A 1 MiB activation capture exercises the striped HBM->HBM DMA path
    # (4 concurrent stripe DMAs) through the module.
    big = jax.random.normal(k5, (2, 8, 128, 128), dtype=jnp.float32)   # 1 MiB
    capture(big)
    cap_big = capture.args_list[1][0]
    jax.block_until_ready(cap_big)
    assert cap_big is not big
    assert cap_big.shape == big.shape and cap_big.dtype == big.dtype
    assert jnp.array_equal(cap_big, big)

    # Exercise both copy kernels directly as well.
    dma_fn = _build_striped_dma_copy(big.shape, big.dtype)
    dma_copy = dma_fn(big)
    jax.block_until_ready(dma_copy)
    assert jnp.array_equal(dma_copy, big)

    # Force a multi-step grid in the tiled fallback to validate its index_map.
    tiled_fn = _build_tiled_copy(big.shape, big.dtype, target_block_bytes=64 * 1024)
    assert tiled_fn is not None
    tiled_copy = tiled_fn(big)
    jax.block_until_ready(tiled_copy)
    assert jnp.array_equal(tiled_copy, big)

    print("KERNEL_OK")
</pallas_src>

<mosaic_0001>
module attributes {stable_mosaic.version = 11 : i64} {
  func.func @_tiled_copy_kernel(%arg0: i32, %arg1: memref<16x16384xf32, #tpu.memory_space<vmem>>, %arg2: memref<16x16384xf32, #tpu.memory_space<vmem>>) attributes {dimension_semantics = [#tpu.dimension_semantics<parallel>], iteration_bounds = array<i64: 1>, scalar_prefetch = 0 : i64, scratch_operands = 0 : i64, tpu.core_type = #tpu.core_type<tc>, window_params = [{transform_indices = @transform_0, window_bounds = array<i64: 16, 16384>}, {transform_indices = @transform_1, window_bounds = array<i64: 16, 16384>}]} {
    %c0 = arith.constant 0 : index
    %c0_0 = arith.constant 0 : index
    %0 = vector.load %arg1[%c0, %c0_0] : memref<16x16384xf32, #tpu.memory_space<vmem>>, vector<16x16384xf32>
    %c0_1 = arith.constant 0 : index
    %c0_2 = arith.constant 0 : index
    %1 = vector.load %arg2[%c0_1, %c0_2] : memref<16x16384xf32, #tpu.memory_space<vmem>>, vector<16x16384xf32>
    tpu.vector_store %arg2[%c0_1, %c0_2], %0 {strides = array<i32>} : memref<16x16384xf32, #tpu.memory_space<vmem>>, vector<16x16384xf32>,
    return
  }
  func.func @transform_0(%arg0: i32) -> (i32, i32) {
    %c0_i32 = arith.constant 0 : i32
    %c0_i32_0 = arith.constant 0 : i32
    return %arg0, %c0_i32 : i32, i32
  }
  func.func @transform_1(%arg0: i32) -> (i32, i32) {
    %c0_i32 = arith.constant 0 : i32
    %c0_i32_0 = arith.constant 0 : i32
    return %arg0, %c0_i32 : i32, i32
  }
}

</mosaic_0001>

<bundles_post_ra>
// kernel: fn.1
= control target key start
LH: loop header
LB: loop body
LE: loop exit
PB: predicated region body
PF: predicated region fallthrough
CT: control target
= control target key end

     0   :  { %s2070_s0 = inlined_call_operand.vmem [shape: f32[16,16384], index: 0, kind: input, shape index: {}]   ;;  %s2071_s1 = inlined_call_operand.vmem [shape: f32[16,16384], index: 1, kind: output, shape index: {}]  }
   0x1   :  { %v8_v0 = vld [vmem:[%s2070_s0] sm:$0xff]  ;;  %v9_v1 = vld [vmem:[%s2070_s0 + $0x8] sm:$0xff]  ;;  %v10_v2 = vld [vmem:[%s2070_s0 + $0x10] sm:$0xff] }
   0x2   :  { %264 = vst [vmem:[%s2071_s1] sm:$0xff] %v8_v0  ;;  %265 = vst [vmem:[%s2071_s1 + $0x8] sm:$0xff] %v9_v1  ;;  %v11_v3 = vld [vmem:[%s2070_s0 + $0x18] sm:$0xff]  ;;  %v12_v4 = vld [vmem:[%s2070_s0 + $0x20] sm:$0xff] }
   0x3   :  { %266 = vst [vmem:[%s2071_s1 + $0x10] sm:$0xff] %v10_v2  ;;  %v13_v5 = vld [vmem:[%s2070_s0 + $0x28] sm:$0xff]  ;;  %267 = vst [vmem:[%s2071_s1 + $0x18] sm:$0xff] %v11_v3  ;;  %v14_v6 = vld [vmem:[%s2070_s0 + $0x30] sm:$0xff] }
   0x4   :  { %268 = vst [vmem:[%s2071_s1 + $0x20] sm:$0xff] %v12_v4  ;;  %269 = vst [vmem:[%s2071_s1 + $0x28] sm:$0xff] %v13_v5  ;;  %v15_v7 = vld [vmem:[%s2070_s0 + $0x38] sm:$0xff]  ;;  %v16_v8 = vld [vmem:[%s2070_s0 + $0x40] sm:$0xff] }
   0x5   :  { %270 = vst [vmem:[%s2071_s1 + $0x30] sm:$0xff] %v14_v6  ;;  %271 = vst [vmem:[%s2071_s1 + $0x38] sm:$0xff] %v15_v7  ;;  %v17_v9 = vld [vmem:[%s2070_s0 + $0x48] sm:$0xff]  ;;  %v18_v10 = vld [vmem:[%s2070_s0 + $0x50] sm:$0xff] }
   0x6   :  { %272 = vst [vmem:[%s2071_s1 + $0x40] sm:$0xff] %v16_v8  ;;  %v19_v11 = vld [vmem:[%s2070_s0 + $0x58] sm:$0xff]  ;;  %273 = vst [vmem:[%s2071_s1 + $0x48] sm:$0xff] %v17_v9  ;;  %v20_v12 = vld [vmem:[%s2070_s0 + $0x60] sm:$0xff] }
   0x7   :  { %274 = vst [vmem:[%s2071_s1 + $0x50] sm:$0xff] %v18_v10  ;;  %275 = vst [vmem:[%s2071_s1 + $0x58] sm:$0xff] %v19_v11  ;;  %v21_v13 = vld [vmem:[%s2070_s0 + $0x68] sm:$0xff]  ;;  %v22_v14 = vld [vmem:[%s2070_s0 + $0x70] sm:$0xff] }
   0x8   :  { %276 = vst [vmem:[%s2071_s1 + $0x60] sm:$0xff] %v20_v12  ;;  %277 = vst [vmem:[%s2071_s1 + $0x68] sm:$0xff] %v21_v13  ;;  %v23_v15 = vld [vmem:[%s2070_s0 + $0x78] sm:$0xff]  ;;  %v24_v16 = vld [vmem:[%s2070_s0 + $0x80] sm:$0xff] }
   0x9   :  { %278 = vst [vmem:[%s2071_s1 + $0x70] sm:$0xff] %v22_v14  ;;  %v25_v17 = vld [vmem:[%s2070_s0 + $0x88] sm:$0xff]  ;;  %279 = vst [vmem:[%s2071_s1 + $0x78] sm:$0xff] %v23_v15  ;;  %v26_v18 = vld [vmem:[%s2070_s0 + $0x90] sm:$0xff] }
   0xa   :  { %280 = vst [vmem:[%s2071_s1 + $0x80] sm:$0xff] %v24_v16  ;;  %281 = vst [vmem:[%s2071_s1 + $0x88] sm:$0xff] %v25_v17  ;;  %v27_v19 = vld [vmem:[%s2070_s0 + $0x98] sm:$0xff]  ;;  %v28_v20 = vld [vmem:[%s2070_s0 + $0xa0] sm:$0xff] }
   0xb   :  { %282 = vst [vmem:[%s2071_s1 + $0x90] sm:$0xff] %v26_v18  ;;  %283 = vst [vmem:[%s2071_s1 + $0x98] sm:$0xff] %v27_v19  ;;  %v29_v21 = vld [vmem:[%s2070_s0 + $0xa8] sm:$0xff]  ;;  %v30_v22 = vld [vmem:[%s2070_s0 + $0xb0] sm:$0xff] }
   0xc   :  { %284 = vst [vmem:[%s2071_s1 + $0xa0] sm:$0xff] %v28_v20  ;;  %v31_v23 = vld [vmem:[%s2070_s0 + $0xb8] sm:$0xff]  ;;  %285 = vst [vmem:[%s2071_s1 + $0xa8] sm:$0xff] %v29_v21  ;;  %v32_v24 = vld [vmem:[%s2070_s0 + $0xc0] sm:$0xff] }
   0xd   :  { %286 = vst [vmem:[%s2071_s1 + $0xb0] sm:$0xff] %v30_v22  ;;  %287 = vst [vmem:[%s2071_s1 + $0xb8] sm:$0xff] %v31_v23  ;;  %v33_v25 = vld [vmem:[%s2070_s0 + $0xc8] sm:$0xff]  ;;  %v34_v26 = vld [vmem:[%s2070_s0 + $0xd0] sm:$0xff] }
   0xe   :  { %288 = vst [vmem:[%s2071_s1 + $0xc0] sm:$0xff] %v32_v24  ;;  %289 = vst [vmem:[%s2071_s1 + $0xc8] sm:$0xff] %v33_v25  ;;  %v35_v27 = vld [vmem:[%s2070_s0 + $0xd8] sm:$0xff]  ;;  %v36_v28 = vld [vmem:[%s2070_s0 + $0xe0] sm:$0xff] }
   0xf   :  { %290 = vst [vmem:[%s2071_s1 + $0xd0] sm:$0xff] %v34_v26  ;;  %v37_v29 = vld [vmem:[%s2070_s0 + $0xe8] sm:$0xff]  ;;  %291 = vst [vmem:[%s2071_s1 + $0xd8] sm:$0xff] %v35_v27  ;;  %v38_v30 = vld [vmem:[%s2070_s0 + $0xf0] sm:$0xff] }
  0x10   :  { %292 = vst [vmem:[%s2071_s1 + $0xe0] sm:$0xff] %v36_v28  ;;  %293 = vst [vmem:[%s2071_s1 + $0xe8] sm:$0xff] %v37_v29  ;;  %v39_v31 = vld [vmem:[%s2070_s0 + $0xf8] sm:$0xff]  ;;  %v40_v32 = vld [vmem:[%s2070_s0 + $0x100] sm:$0xff] }
  0x11   :  { %294 = vst [vmem:[%s2071_s1 + $0xf0] sm:$0xff] %v38_v30  ;;  %295 = vst [vmem:[%s2071_s1 + $0xf8] sm:$0xff] %v39_v31  ;;  %v41_v33 = vld [vmem:[%s2070_s0 + $0x108] sm:$0xff]  ;;  %v42_v34 = vld [vmem:[%s2070_s0 + $0x110] sm:$0xff] }
  0x12   :  { %296 = vst [vmem:[%s2071_s1 + $0x100] sm:$0xff] %v40_v32  ;;  %v43_v35 = vld [vmem:[%s2070_s0 + $0x118] sm:$0xff]  ;;  %297 = vst [vmem:[%s2071_s1 + $0x108] sm:$0xff] %v41_v33  ;;  %v44_v36 = vld [vmem:[%s2070_s0 + $0x120] sm:$0xff] }
  0x13   :  { %298 = vst [vmem:[%s2071_s1 + $0x110] sm:$0xff] %v42_v34  ;;  %299 = vst [vmem:[%s2071_s1 + $0x118] sm:$0xff] %v43_v35  ;;  %v45_v37 = vld [vmem:[%s2070_s0 + $0x128] sm:$0xff]  ;;  %v46_v38 = vld [vmem:[%s2070_s0 + $0x130] sm:$0xff] }
  0x14   :  { %300 = vst [vmem:[%s2071_s1 + $0x120] sm:$0xff] %v44_v36  ;;  %301 = vst [vmem:[%s2071_s1 + $0x128] sm:$0xff] %v45_v37  ;;  %v47_v39 = vld [vmem:[%s2070_s0 + $0x138] sm:$0xff]  ;;  %v48_v40 = vld [vmem:[%s2070_s0 + $0x140] sm:$0xff] }
  0x15   :  { %302 = vst [vmem:[%s2071_s1 + $0x130] sm:$0xff] %v46_v38  ;;  %v49_v41 = vld [vmem:[%s2070_s0 + $0x148] sm:$0xff]  ;;  %303 = vst [vmem:[%s2071_s1 + $0x138] sm:$0xff] %v47_v39  ;;  %v50_v42 = vld [vmem:[%s2070_s0 + $0x150] sm:$0xff] }
  0x16   :  { %304 = vst [vmem:[%s2071_s1 + $0x140] sm:$0xff] %v48_v40  ;;  %305 = vst [vmem:[%s2071_s1 + $0x148] sm:$0xff] %v49_v41  ;;  %v51_v43 = vld [vmem:[%s2070_s0 + $0x158] sm:$0xff]  ;;  %v52_v44 = vld [vmem:[%s2070_s0 + $0x160] sm:$0xff] }
  0x17   :  { %306 = vst [vmem:[%s2071_s1 + $0x150] sm:$0xff] %v50_v42  ;;  %307 = vst [vmem:[%s2071_s1 + $0x158] sm:$0xff] %v51_v43  ;;  %v53_v45 = vld [vmem:[%s2070_s0 + $0x168] sm:$0xff]  ;;  %v54_v46 = vld [vmem:[%s2070_s0 + $0x170] sm:$0xff] }
  0x18   :  { %308 = vst [vmem:[%s2071_s1 + $0x160] sm:$0xff] %v52_v44  ;;  %v55_v47 = vld [vmem:[%s2070_s0 + $0x178] sm:$0xff]  ;;  %309 = vst [vmem:[%s2071_s1 + $0x168] sm:$0xff] %v53_v45  ;;  %v56_v48 = vld [vmem:[%s2070_s0 + $0x180] sm:$0xff] }
  0x19   :  { %310 = vst [vmem:[%s2071_s1 + $0x170] sm:$0xff] %v54_v46  ;;  %311 = vst [vmem:[%s2071_s1 + $0x178] sm:$0xff] %v55_v47  ;;  %v57_v49 = vld [vmem:[%s2070_s0 + $0x188] sm:$0xff]  ;;  %v58_v50 = vld [vmem:[%s2070_s0 + $0x190] sm:$0xff] }
  0x1a   :  { %312 = vst [vmem:[%s2071_s1 + $0x180] sm:$0xff] %v56_v48  ;;  %313 = vst [vmem:[%s2071_s1 + $0x188] sm:$0xff] %v57_v49  ;;  %v59_v51 = vld [vmem:[%s2070_s0 + $0x198] sm:$0xff]  ;;  %v60_v52 = vld [vmem:[%s2070_s0 + $0x1a0] sm:$0xff] }
  0x1b   :  { %314 = vst [vmem:[%s2071_s1 + $0x190] sm:$0xff] %v58_v50  ;;  %v61_v53 = vld [vmem:[%s2070_s0 + $0x1a8] sm:$0xff]  ;;  %315 = vst [vmem:[%s2071_s1 + $0x198] sm:$0xff] %v59_v51  ;;  %v62_v54 = vld [vmem:[%s2070_s0 + $0x1b0] sm:$0xff] }
  0x1c   :  { %316 = vst [vmem:[%s2071_s1 + $0x1a0] sm:$0xff] %v60_v52  ;;  %317 = vst [vmem:[%s2071_s1 + $0x1a8] sm:$0xff] %v61_v53  ;;  %v63_v55 = vld [vmem:[%s2070_s0 + $0x1b8] sm:$0xff]  ;;  %v64_v56 = vld [vmem:[%s2070_s0 + $0x1c0] sm:$0xff] }
  0x1d   :  { %318 = vst [vmem:[%s2071_s1 + $0x1b0] sm:$0xff] %v62_v54  ;;  %319 = vst [vmem:[%s2071_s1 + $0x1b8] sm:$0xff] %v63_v55  ;;  %v65_v57 = vld [vmem:[%s2070_s0 + $0x1c8] sm:$0xff]  ;;  %v66_v58 = vld [vmem:[%s2070_s0 + $0x1d0] sm:$0xff] }
  0x1e   :  { %320 = vst [vmem:[%s2071_s1 + $0x1c0] sm:$0xff] %v64_v56  ;;  %v67_v59 = vld [vmem:[%s2070_s0 + $0x1d8] sm:$0xff]  ;;  %321 = vst [vmem:[%s2071_s1 + $0x1c8] sm:$0xff] %v65_v57  ;;  %v68_v60 = vld [vmem:[%s2070_s0 + $0x1e0] sm:$0xff] }
  0x1f   :  { %322 = vst [vmem:[%s2071_s1 + $0x1d0] sm:$0xff] %v66_v58  ;;  %323 = vst [vmem:[%s2071_s1 + $0x1d8] sm:$0xff] %v67_v59  ;;  %v69_v61 = vld [vmem:[%s2070_s0 + $0x1e8] sm:$0xff]  ;;  %v70_v62 = vld [vmem:[%s2070_s0 + $0x1f0] sm:$0xff] }
  0x20   :  { %324 = vst [vmem:[%s2071_s1 + $0x1e0] sm:$0xff] %v68_v60  ;;  %325 = vst [vmem:[%s2071_s1 + $0x1e8] sm:$0xff] %v69_v61  ;;  %v71_v63 = vld [vmem:[%s2070_s0 + $0x1f8] sm:$0xff]  ;;  %v72_v0 = vld [vmem:[%s2070_s0 + $0x200] sm:$0xff] }
  0x21   :  { %326 = vst [vmem:[%s2071_s1 + $0x1f0] sm:$0xff] %v70_v62  ;;  %v73_v1 = vld [vmem:[%s2070_s0 + $0x208] sm:$0xff]  ;;  %327 = vst [vmem:[%s2071_s1 + $0x1f8] sm:$0xff] %v71_v63  ;;  %v74_v2 = vld [vmem:[%s2070_s0 + $0x210] sm:$0xff] }
  0x22   :  { %328 = vst [vmem:[%s2071_s1 + $0x200] sm:$0xff] %v72_v0  ;;  %329 = vst [vmem:[%s2071_s1 + $0x208] sm:$0xff] %v73_v1  ;;  %v75_v3 = vld [vmem:[%s2070_s0 + $0x218] sm:$0xff]  ;;  %v76_v4 = vld [vmem:[%s2070_s0 + $0x220] sm:$0xff] }
  0x23   :  { %330 = vst [vmem:[%s2071_s1 + $0x210] sm:$0xff] %v74_v2  ;;  %331 = vst [vmem:[%s2071_s1 + $0x218] sm:$0xff] %v75_v3  ;;  %v77_v5 = vld [vmem:[%s2070_s0 + $0x228] sm:$0xff]  ;;  %v78_v6 = vld [vmem:[%s2070_s0 + $0x230] sm:$0xff] }
  0x24   :  { %332 = vst [vmem:[%s2071_s1 + $0x220] sm:$0xff] %v76_v4  ;;  %v79_v7 = vld [vmem:[%s2070_s0 + $0x238] sm:$0xff]  ;;  %333 = vst [vmem:[%s2071_s1 + $0x228] sm:$0xff] %v77_v5  ;;  %v80_v8 = vld [vmem:[%s2070_s0 + $0x240] sm:$0xff] }
  0x25   :  { %334 = vst [vmem:[%s2071_s1 + $0x230] sm:$0xff] %v78_v6  ;;  %335 = vst [vmem:[%s2071_s1 + $0x238] sm:$0xff] %v79_v7  ;;  %v81_v9 = vld [vmem:[%s2070_s0 + $0x248] sm:$0xff]  ;;  %v82_v10 = vld [vmem:[%s2070_s0 + $0x250] sm:$0xff] }
  0x26   :  { %336 = vst [vmem:[%s2071_s1 + $0x240] sm:$0xff] %v80_v8  ;;  %337 = vst [vmem:[%s2071_s1 + $0x248] sm:$0xff] %v81_v9  ;;  %v83_v11 = vld [vmem:[%s2070_s0 + $0x258] sm:$0xff]  ;;  %v84_v12 = vld [vmem:[%s2070_s0 + $0x260] sm:$0xff] }
  0x27   :  { %338 = vst [vmem:[%s2071_s1 + $0x250] sm:$0xff] %v82_v10  ;;  %v85_v13 = vld [vmem:[%s2070_s0 + $0x268] sm:$0xff]  ;;  %339 = vst [vmem:[%s2071_s1 + $0x258] sm:$0xff] %v83_v11  ;;  %v86_v14 = vld [vmem:[%s2070_s0 + $0x270] sm:$0xff] }
  0x28   :  { %340 = vst [vmem:[%s2071_s1 + $0x260] sm:$0xff] %v84_v12  ;;  %341 = vst [vmem:[%s2071_s1 + $0x268] sm:$0xff] %v85_v13  ;;  %v87_v15 = vld [vmem:[%s2070_s0 + $0x278] sm:$0xff]  ;;  %v88_v16 = vld [vmem:[%s2070_s0 + $0x280] sm:$0xff] }
  0x29   :  { %342 = vst [vmem:[%s2071_s1 + $0x270] sm:$0xff] %v86_v14  ;;  %343 = vst [vmem:[%s2071_s1 + $0x278] sm:$0xff] %v87_v15  ;;  %v89_v17 = vld [vmem:[%s2070_s0 + $0x288] sm:$0xff]  ;;  %v90_v18 = vld [vmem:[%s2070_s0 + $0x290] sm:$0xff] }
  0x2a   :  { %344 = vst [vmem:[%s2071_s1 + $0x280] sm:$0xff] %v88_v16  ;;  %v91_v19 = vld [vmem:[%s2070_s0 + $0x298] sm:$0xff]  ;;  %345 = vst [vmem:[%s2071_s1 + $0x288] sm:$0xff] %v89_v17  ;;  %v92_v20 = vld [vmem:[%s2070_s0 + $0x2a0] sm:$0xff] }
  0x2b   :  { %346 = vst [vmem:[%s2071_s1 + $0x290] sm:$0xff] %v90_v18  ;;  %347 = vst [vmem:[%s2071_s1 + $0x298] sm:$0xff] %v91_v19  ;;  %v93_v21 = vld [vmem:[%s2070_s0 + $0x2a8] sm:$0xff]  ;;  %v94_v22 = vld [vmem:[%s2070_s0 + $0x2b0] sm:$0xff] }
  0x2c   :  { %348 = vst [vmem:[%s2071_s1 + $0x2a0] sm:$0xff] %v92_v20  ;;  %349 = vst [vmem:[%s2071_s1 + $0x2a8] sm:$0xff] %v93_v21  ;;  %v95_v23 = vld [vmem:[%s2070_s0 + $0x2b8] sm:$0xff]  ;;  %v96_v24 = vld [vmem:[%s2070_s0 + $0x2c0] sm:$0xff] }
  0x2d   :  { %350 = vst [vmem:[%s2071_s1 + $0x2b0] sm:$0xff] %v94_v22  ;;  %v97_v25 = vld [vmem:[%s2070_s0 + $0x2c8] sm:$0xff]  ;;  %351 = vst [vmem:[%s2071_s1 + $0x2b8] sm:$0xff] %v95_v23  ;;  %v98_v26 = vld [vmem:[%s2070_s0 + $0x2d0] sm:$0xff] }
  0x2e   :  { %352 = vst [vmem:[%s2071_s1 + $0x2c0] sm:$0xff] %v96_v24  ;;  %353 = vst [vmem:[%s2071_s1 + $0x2c8] sm:$0xff] %v97_v25  ;;  %v99_v27 = vld [vmem:[%s2070_s0 + $0x2d8] sm:$0xff]  ;;  %v100_v28 = vld [vmem:[%s2070_s0 + $0x2e0] sm:$0xff] }
  0x2f   :  { %354 = vst [vmem:[%s2071_s1 + $0x2d0] sm:$0xff] %v98_v26  ;;  %355 = vst [vmem:[%s2071_s1 + $0x2d8] sm:$0xff] %v99_v27  ;;  %v101_v29 = vld [vmem:[%s2070_s0 + $0x2e8] sm:$0xff]  ;;  %v102_v30 = vld [vmem:[%s2070_s0 + $0x2f0] sm:$0xff] }
  0x30   :  { %356 = vst [vmem:[%s2071_s1 + $0x2e0] sm:$0xff] %v100_v28  ;;  %v103_v31 = vld [vmem:[%s2070_s0 + $0x2f8] sm:$0xff]  ;;  %357 = vst [vmem:[%s2071_s1 + $0x2e8] sm:$0xff] %v101_v29  ;;  %v104_v32 = vld [vmem:[%s2070_s0 + $0x300] sm:$0xff] }
  0x31   :  { %358 = vst [vmem:[%s2071_s1 + $0x2f0] sm:$0xff] %v102_v30  ;;  %359 = vst [vmem:[%s2071_s1 + $0x2f8] sm:$0xff] %v103_v31  ;;  %v105_v33 = vld [vmem:[%s2070_s0 + $0x308] sm:$0xff]  ;;  %v106_v34 = vld [vmem:[%s2070_s0 + $0x310] sm:$0xff] }
  0x32   :  { %360 = vst [vmem:[%s2071_s1 + $0x300] sm:$0xff] %v104_v32  ;;  %361 = vst [vmem:[%s2071_s1 + $0x308] sm:$0xff] %v105_v33  ;;  %v107_v35 = vld [vmem:[%s2070_s0 + $0x318] sm:$0xff]  ;;  %v108_v36 = vld [vmem:[%s2070_s0 + $0x320] sm:$0xff] }
  0x33   :  { %362 = vst [vmem:[%s2071_s1 + $0x310] sm:$0xff] %v106_v34  ;;  %v109_v37 = vld [vmem:[%s2070_s0 + $0x328] sm:$0xff]  ;;  %363 = vst [vmem:[%s2071_s1 + $0x318] sm:$0xff] %v107_v35  ;;  %v110_v38 = vld [vmem:[%s2070_s0 + $0x330] sm:$0xff] }
  0x34   :  { %364 = vst [vmem:[%s2071_s1 + $0x320] sm:$0xff] %v108_v36  ;;  %365 = vst [vmem:[%s2071_s1 + $0x328] sm:$0xff] %v109_v37  ;;  %v111_v39 = vld [vmem:[%s2070_s0 + $0x338] sm:$0xff]  ;;  %v112_v40 = vld [vmem:[%s2070_s0 + $0x340] sm:$0xff] }
  0x35   :  { %366 = vst [vmem:[%s2071_s1 + $0x330] sm:$0xff] %v110_v38  ;;  %367 = vst [vmem:[%s2071_s1 + $0x338] sm:$0xff] %v111_v39  ;;  %v113_v41 = vld [vmem:[%s2070_s0 + $0x348] sm:$0xff]  ;;  %v114_v42 = vld [vmem:[%s2070_s0 + $0x350] sm:$0xff] }
  0x36   :  { %368 = vst [vmem:[%s2071_s1 + $0x340] sm:$0xff] %v112_v40  ;;  %v115_v43 = vld [vmem:[%s2070_s0 + $0x358] sm:$0xff]  ;;  %369 = vst [vmem:[%s2071_s1 + $0x348] sm:$0xff] %v113_v41  ;;  %v116_v44 = vld [vmem:[%s2070_s0 + $0x360] sm:$0xff] }
  0x37   :  { %370 = vst [vmem:[%s2071_s1 + $0x350] sm:$0xff] %v114_v42  ;;  %371 = vst [vmem:[%s2071_s1 + $0x358] sm:$0xff] %v115_v43  ;;  %v117_v45 = vld [vmem:[%s2070_s0 + $0x368] sm:$0xff]  ;;  %v118_v46 = vld [vmem:[%s2070_s0 + $0x370] sm:$0xff] }
  0x38   :  { %372 = vst [vmem:[%s2071_s1 + $0x360] sm:$0xff] %v116_v44  ;;  %373 = vst [vmem:[%s2071_s1 + $0x368] sm:$0xff] %v117_v45  ;;  %v119_v47 = vld [vmem:[%s2070_s0 + $0x378] sm:$0xff]  ;;  %v120_v48 = vld [vmem:[%s2070_s0 + $0x380] sm:$0xff] }
  0x39   :  { %374 = vst [vmem:[%s2071_s1 + $0x370] sm:$0xff] %v118_v46  ;;  %v121_v49 = vld [vmem:[%s2070_s0 + $0x388] sm:$0xff]  ;;  %375 = vst [vmem:[%s2071_s1 + $0x378] sm:$0xff] %v119_v47  ;;  %v122_v50 = vld [vmem:[%s2070_s0 + $0x390] sm:$0xff] }
  0x3a   :  { %376 = vst [vmem:[%s2071_s1 + $0x380] sm:$0xff] %v120_v48  ;;  %377 = vst [vmem:[%s2071_s1 + $0x388] sm:$0xff] %v121_v49  ;;  %v123_v51 = vld [vmem:[%s2070_s0 + $0x398] sm:$0xff]  ;;  %v124_v52 = vld [vmem:[%s2070_s0 + $0x3a0] sm:$0xff] }
  0x3b   :  { %378 = vst [vmem:[%s2071_s1 + $0x390] sm:$0xff] %v122_v50  ;;  %379 = vst [vmem:[%s2071_s1 + $0x398] sm:$0xff] %v123_v51  ;;  %v125_v53 = vld [vmem:[%s2070_s0 + $0x3a8] sm:$0xff]  ;;  %v126_v54 = vld [vmem:[%s2070_s0 + $0x3b0] sm:$0xff] }
  0x3c   :  { %380 = vst [vmem:[%s2071_s1 + $0x3a0] sm:$0xff] %v124_v52  ;;  %v127_v55 = vld [vmem:[%s2070_s0 + $0x3b8] sm:$0xff]  ;;  %381 = vst [vmem:[%s2071_s1 + $0x3a8] sm:$0xff] %v125_v53  ;;  %v128_v56 = vld [vmem:[%s2070_s0 + $0x3c0] sm:$0xff] }
  0x3d   :  { %382 = vst [vmem:[%s2071_s1 + $0x3b0] sm:$0xff] %v126_v54  ;;  %383 = vst [vmem:[%s2071_s1 + $0x3b8] sm:$0xff] %v127_v55  ;;  %v129_v57 = vld [vmem:[%s2070_s0 + $0x3c8] sm:$0xff]  ;;  %v130_v58 = vld [vmem:[%s2070_s0 + $0x3d0] sm:$0xff] }
  0x3e   :  { %384 = vst [vmem:[%s2071_s1 + $0x3c0] sm:$0xff] %v128_v56  ;;  %385 = vst [vmem:[%s2071_s1 + $0x3c8] sm:$0xff] %v129_v57  ;;  %v131_v59 = vld [vmem:[%s2070_s0 + $0x3d8] sm:$0xff]  ;;  %v132_v60 = vld [vmem:[%s2070_s0 + $0x3e0] sm:$0xff] }
  0x3f   :  { %386 = vst [vmem:[%s2071_s1 + $0x3d0] sm:$0xff] %v130_v58  ;;  %v133_v61 = vld [vmem:[%s2070_s0 + $0x3e8] sm:$0xff]  ;;  %387 = vst [vmem:[%s2071_s1 + $0x3d8] sm:$0xff] %v131_v59  ;;  %v134_v62 = vld [vmem:[%s2070_s0 + $0x3f0] sm:$0xff] }
  0x40   :  { %388 = vst [vmem:[%s2071_s1 + $0x3e0] sm:$0xff] %v132_v60  ;;  %389 = vst [vmem:[%s2071_s1 + $0x3e8] sm:$0xff] %v133_v61  ;;  %v135_v63 = vld [vmem:[%s2070_s0 + $0x3f8] sm:$0xff]  ;;  %v136_v0 = vld [vmem:[%s2070_s0 + $0x400] sm:$0xff] }
  0x41   :  { %390 = vst [vmem:[%s2071_s1 + $0x3f0] sm:$0xff] %v134_v62  ;;  %391 = vst [vmem:[%s2071_s1 + $0x3f8] sm:$0xff] %v135_v63  ;;  %v137_v1 = vld [vmem:[%s2070_s0 + $0x408] sm:$0xff]  ;;  %v138_v2 = vld [vmem:[%s2070_s0 + $0x410] sm:$0xff] }
  0x42   :  { %392 = vst [vmem:[%s2071_s1 + $0x400] sm:$0xff] %v136_v0  ;;  %v139_v3 = vld [vmem:[%s2070_s0 + $0x418] sm:$0xff]  ;;  %393 = vst [vmem:[%s2071_s1 + $0x408] sm:$0xff] %v137_v1  ;;  %v140_v4 = vld [vmem:[%s2070_s0 + $0x420] sm:$0xff] }
  0x43   :  { %394 = vst [vmem:[%s2071_s1 + $0x410] sm:$0xff] %v138_v2  ;;  %395 = vst [vmem:[%s2071_s1 + $0x418] sm:$0xff] %v139_v3  ;;  %v141_v5 = vld [vmem:[%s2070_s0 + $0x428] sm:$0xff]  ;;  %v142_v6 = vld [vmem:[%s2070_s0 + $0x430] sm:$0xff] }
  0x44   :  { %396 = vst [vmem:[%s2071_s1 + $0x420] sm:$0xff] %v140_v4  ;;  %397 = vst [vmem:[%s2071_s1 + $0x428] sm:$0xff] %v141_v5  ;;  %v143_v7 = vld [vmem:[%s2070_s0 + $0x438] sm:$0xff]  ;;  %v144_v8 = vld [vmem:[%s2070_s0 + $0x440] sm:$0xff] }
  0x45   :  { %398 = vst [vmem:[%s2071_s1 + $0x430] sm:$0xff] %v142_v6  ;;  %v145_v9 = vld [vmem:[%s2070_s0 + $0x448] sm:$0xff]  ;;  %399 = vst [vmem:[%s2071_s1 + $0x438] sm:$0xff] %v143_v7  ;;  %v146_v10 = vld [vmem:[%s2070_s0 + $0x450] sm:$0xff] }
  0x46   :  { %400 = vst [vmem:[%s2071_s1 + $0x440] sm:$0xff] %v144_v8  ;;  %401 = vst [vmem:[%s2071_s1 + $0x448] sm:$0xff] %v145_v9  ;;  %v147_v11 = vld [vmem:[%s2070_s0 + $0x458] sm:$0xff]  ;;  %v148_v12 = vld [vmem:[%s2070_s0 + $0x460] sm:$0xff] }
  0x47   :  { %402 = vst [vmem:[%s2071_s1 + $0x450] sm:$0xff] %v146_v10  ;;  %403 = vst [vmem:[%s2071_s1 + $0x458] sm:$0xff] %v147_v11  ;;  %v149_v13 = vld [vmem:[%s2070_s0 + $0x468] sm:$0xff]  ;;  %v150_v14 = vld [vmem:[%s2070_s0 + $0x470] sm:$0xff] }
  0x48   :  { %404 = vst [vmem:[%s2071_s1 + $0x460] sm:$0xff] %v148_v12  ;;  %v151_v15 = vld [vmem:[%s2070_s0 + $0x478] sm:$0xff]  ;;  %405 = vst [vmem:[%s2071_s1 + $0x468] sm:$0xff] %v149_v13  ;;  %v152_v16 = vld [vmem:[%s2070_s0 + $0x480] sm:$0xff] }
  0x49   :  { %406 = vst [vmem:[%s2071_s1 + $0x470] sm:$0xff] %v150_v14  ;;  %407 = vst [vmem:[%s2071_s1 + $0x478] sm:$0xff] %v151_v15  ;;  %v153_v17 = vld [vmem:[%s2070_s0 + $0x488] sm:$0xff]  ;;  %v154_v18 = vld [vmem:[%s2070_s0 + $0x490] sm:$0xff] }
  0x4a   :  { %408 = vst [vmem:[%s2071_s1 + $0x480] sm:$0xff] %v152_v16  ;;  %409 = vst [vmem:[%s2071_s1 + $0x488] sm:$0xff] %v153_v17  ;;  %v155_v19 = vld [vmem:[%s2070_s0 + $0x498] sm:$0xff]  ;;  %v156_v20 = vld [vmem:[%s2070_s0 + $0x4a0] sm:$0xff] }
  0x4b   :  { %410 = vst [vmem:[%s2071_s1 + $0x490] sm:$0xff] %v154_v18  ;;  %v157_v21 = vld [vmem:[%s2070_s0 + $0x4a8] sm:$0xff]  ;;  %411 = vst [vmem:[%s2071_s1 + $0x498] sm:$0xff] %v155_v19  ;;  %v158_v22 = vld [vmem:[%s2070_s0 + $0x4b0] sm:$0xff] }
  0x4c   :  { %412 = vst [vmem:[%s2071_s1 + $0x4a0] sm:$0xff] %v156_v20  ;;  %413 = vst [vmem:[%s2071_s1 + $0x4a8] sm:$0xff] %v157_v21  ;;  %v159_v23 = vld [vmem:[%s2070_s0 + $0x4b8] sm:$0xff]  ;;  %v160_v24 = vld [vmem:[%s2070_s0 + $0x4c0] sm:$0xff] }
  0x4d   :  { %414 = vst [vmem:[%s2071_s1 + $0x4b0] sm:$0xff] %v158_v22  ;;  %415 = vst [vmem:[%s2071_s1 + $0x4b8] sm:$0xff] %v159_v23  ;;  %v161_v25 = vld [vmem:[%s2070_s0 + $0x4c8] sm:$0xff]  ;;  %v162_v26 = vld [vmem:[%s2070_s0 + $0x4d0] sm:$0xff] }
  0x4e   :  { %416 = vst [vmem:[%s2071_s1 + $0x4c0] sm:$0xff] %v160_v24  ;;  %v163_v27 = vld [vmem:[%s2070_s0 + $0x4d8] sm:$0xff]  ;;  %417 = vst [vmem:[%s2071_s1 + $0x4c8] sm:$0xff] %v161_v25  ;;  %v164_v28 = vld [vmem:[%s2070_s0 + $0x4e0] sm:$0xff] }
  0x4f   :  { %418 = vst [vmem:[%s2071_s1 + $0x4d0] sm:$0xff] %v162_v26  ;;  %419 = vst [vmem:[%s2071_s1 + $0x4d8] sm:$0xff] %v163_v27  ;;  %v165_v29 = vld [vmem:[%s2070_s0 + $0x4e8] sm:$0xff]  ;;  %v166_v30 = vld [vmem:[%s2070_s0 + $0x4f0] sm:$0xff] }
  0x50   :  { %420 = vst [vmem:[%s2071_s1 + $0x4e0] sm:$0xff] %v164_v28  ;;  %421 = vst [vmem:[%s2071_s1 + $0x4e8] sm:$0xff] %v165_v29  ;;  %v167_v31 = vld [vmem:[%s2070_s0 + $0x4f8] sm:$0xff]  ;;  %v168_v32 = vld [vmem:[%s2070_s0 + $0x500] sm:$0xff] }
  0x51   :  { %422 = vst [vmem:[%s2071_s1 + $0x4f0] sm:$0xff] %v166_v30  ;;  %v169_v33 = vld [vmem:[%s2070_s0 + $0x508] sm:$0xff]  ;;  %423 = vst [vmem:[%s2071_s1 + $0x4f8] sm:$0xff] %v167_v31  ;;  %v170_v34 = vld [vmem:[%s2070_s0 + $0x510] sm:$0xff] }
  0x52   :  { %424 = vst [vmem:[%s2071_s1 + $0x500] sm:$0xff] %v168_v32  ;;  %425 = vst [vmem:[%s2071_s1 + $0x508] sm:$0xff] %v169_v33  ;;  %v171_v35 = vld [vmem:[%s2070_s0 + $0x518] sm:$0xff]  ;;  %v172_v36 = vld [vmem:[%s2070_s0 + $0x520] sm:$0xff] }
  0x53   :  { %426 = vst [vmem:[%s2071_s1 + $0x510] sm:$0xff] %v170_v34  ;;  %427 = vst [vmem:[%s2071_s1 + $0x518] sm:$0xff] %v171_v35  ;;  %v173_v37 = vld [vmem:[%s2070_s0 + $0x528] sm:$0xff]  ;;  %v174_v38 = vld [vmem:[%s2070_s0 + $0x530] sm:$0xff] }
  0x54   :  { %428 = vst [vmem:[%s2071_s1 + $0x520] sm:$0xff] %v172_v36  ;;  %v175_v39 = vld [vmem:[%s2070_s0 + $0x538] sm:$0xff]  ;;  %429 = vst [vmem:[%s2071_s1 + $0x528] sm:$0xff] %v173_v37  ;;  %v176_v40 = vld [vmem:[%s2070_s0 + $0x540] sm:$0xff] }
  0x55   :  { %430 = vst [vmem:[%s2071_s1 + $0x530] sm:$0xff] %v174_v38  ;;  %431 = vst [vmem:[%s2071_s1 + $0x538] sm:$0xff] %v175_v39  ;;  %v177_v41 = vld [vmem:[%s2070_s0 + $0x548] sm:$0xff]  ;;  %v178_v42 = vld [vmem:[%s2070_s0 + $0x550] sm:$0xff] }
  0x56   :  { %432 = vst [vmem:[%s2071_s1 + $0x540] sm:$0xff] %v176_v40  ;;  %433 = vst [vmem:[%s2071_s1 + $0x548] sm:$0xff] %v177_v41  ;;  %v179_v43 = vld [vmem:[%s2070_s0 + $0x558] sm:$0xff]  ;;  %v180_v44 = vld [vmem:[%s2070_s0 + $0x560] sm:$0xff] }
  0x57   :  { %434 = vst [vmem:[%s2071_s1 + $0x550] sm:$0xff] %v178_v42  ;;  %v181_v45 = vld [vmem:[%s2070_s0 + $0x568] sm:$0xff]  ;;  %435 = vst [vmem:[%s2071_s1 + $0x558] sm:$0xff] %v179_v43  ;;  %v182_v46 = vld [vmem:[%s2070_s0 + $0x570] sm:$0xff] }
  0x58   :  { %436 = vst [vmem:[%s2071_s1 + $0x560] sm:$0xff] %v180_v44  ;;  %437 = vst [vmem:[%s2071_s1 + $0x568] sm:$0xff] %v181_v45  ;;  %v183_v47 = vld [vmem:[%s2070_s0 + $0x578] sm:$0xff]  ;;  %v184_v48 = vld [vmem:[%s2070_s0 + $0x580] sm:$0xff] }
  0x59   :  { %438 = vst [vmem:[%s2071_s1 + $0x570] sm:$0xff] %v182_v46  ;;  %439 = vst [vmem:[%s2071_s1 + $0x578] sm:$0xff] %v183_v47  ;;  %v185_v49 = vld [vmem:[%s2070_s0 + $0x588] sm:$0xff]  ;;  %v186_v50 = vld [vmem:[%s2070_s0 + $0x590] sm:$0xff] }
  0x5a   :  { %440 = vst [vmem:[%s2071_s1 + $0x580] sm:$0xff] %v184_v48  ;;  %v187_v51 = vld [vmem:[%s2070_s0 + $0x598] sm:$0xff]  ;;  %441 = vst [vmem:[%s2071_s1 + $0x588] sm:$0xff] %v185_v49  ;;  %v188_v52 = vld [vmem:[%s2070_s0 + $0x5a0] sm:$0xff] }
  0x5b   :  { %442 = vst [vmem:[%s2071_s1 + $0x590] sm:$0xff] %v186_v50  ;;  %443 = vst [vmem:[%s2071_s1 + $0x598] sm:$0xff] %v187_v51  ;;  %v189_v53 = vld [vmem:[%s2070_s0 + $0x5a8] sm:$0xff]  ;;  %v190_v54 = vld [vmem:[%s2070_s0 + $0x5b0] sm:$0xff] }
  0x5c   :  { %444 = vst [vmem:[%s2071_s1 + $0x5a0] sm:$0xff] %v188_v52  ;;  %445 = vst [vmem:[%s2071_s1 + $0x5a8] sm:$0xff] %v189_v53  ;;  %v191_v55 = vld [vmem:[%s2070_s0 + $0x5b8] sm:$0xff]  ;;  %v192_v56 = vld [vmem:[%s2070_s0 + $0x5c0] sm:$0xff] }
  0x5d   :  { %446 = vst [vmem:[%s2071_s1 + $0x5b0] sm:$0xff] %v190_v54  ;;  %v193_v57 = vld [vmem:[%s2070_s0 + $0x5c8] sm:$0xff]  ;;  %447 = vst [vmem:[%s2071_s1 + $0x5b8] sm:$0xff] %v191_v55  ;;  %v194_v58 = vld [vmem:[%s2070_s0 + $0x5d0] sm:$0xff] }
  0x5e   :  { %448 = vst [vmem:[%s2071_s1 + $0x5c0] sm:$0xff] %v192_v56  ;;  %449 = vst [vmem:[%s2071_s1 + $0x5c8] sm:$0xff] %v193_v57  ;;  %v195_v59 = vld [vmem:[%s2070_s0 + $0x5d8] sm:$0xff]  ;;  %v196_v60 = vld [vmem:[%s2070_s0 + $0x5e0] sm:$0xff] }
  0x5f   :  { %450 = vst [vmem:[%s2071_s1 + $0x5d0] sm:$0xff] %v194_v58  ;;  %451 = vst [vmem:[%s2071_s1 + $0x5d8] sm:$0xff] %v195_v59  ;;  %v197_v61 = vld [vmem:[%s2070_s0 + $0x5e8] sm:$0xff]  ;;  %v198_v62 = vld [vmem:[%s2070_s0 + $0x5f0] sm:$0xff] }
  0x60   :  { %452 = vst [vmem:[%s2071_s1 + $0x5e0] sm:$0xff] %v196_v60  ;;  %v199_v63 = vld [vmem:[%s2070_s0 + $0x5f8] sm:$0xff]  ;;  %453 = vst [vmem:[%s2071_s1 + $0x5e8] sm:$0xff] %v197_v61  ;;  %v200_v0 = vld [vmem:[%s2070_s0 + $0x600] sm:$0xff] }
  0x61   :  { %454 = vst [vmem:[%s2071_s1 + $0x5f0] sm:$0xff] %v198_v62  ;;  %455 = vst [vmem:[%s2071_s1 + $0x5f8] sm:$0xff] %v199_v63  ;;  %v201_v1 = vld [vmem:[%s2070_s0 + $0x608] sm:$0xff]  ;;  %v202_v2 = vld [vmem:[%s2070_s0 + $0x610] sm:$0xff] }
  0x62   :  { %456 = vst [vmem:[%s2071_s1 + $0x600] sm:$0xff] %v200_v0  ;;  %457 = vst [vmem:[%s2071_s1 + $0x608] sm:$0xff] %v201_v1  ;;  %v203_v3 = vld [vmem:[%s2070_s0 + $0x618] sm:$0xff]  ;;  %v204_v4 = vld [vmem:[%s2070_s0 + $0x620] sm:$0xff] }
  0x63   :  { %458 = vst [vmem:[%s2071_s1 + $0x610] sm:$0xff] %v202_v2  ;;  %v205_v5 = vld [vmem:[%s2070_s0 + $0x628] sm:$0xff]  ;;  %459 = vst [vmem:[%s2071_s1 + $0x618] sm:$0xff] %v203_v3  ;;  %v206_v6 = vld [vmem:[%s2070_s0 + $0x630] sm:$0xff] }
  0x64   :  { %460 = vst [vmem:[%s2071_s1 + $0x620] sm:$0xff] %v204_v4  ;;  %461 = vst [vmem:[%s2071_s1 + $0x628] sm:$0xff] %v205_v5  ;;  %v207_v7 = vld [vmem:[%s2070_s0 + $0x638] sm:$0xff]  ;;  %v208_v8 = vld [vmem:[%s2070_s0 + $0x640] sm:$0xff] }
  0x65   :  { %462 = vst [vmem:[%s2071_s1 + $0x630] sm:$0xff] %v206_v6  ;;  %463 = vst [vmem:[%s2071_s1 + $0x638] sm:$0xff] %v207_v7  ;;  %v209_v9 = vld [vmem:[%s2070_s0 + $0x648] sm:$0xff]  ;;  %v210_v10 = vld [vmem:[%s2070_s0 + $0x650] sm:$0xff] }
  0x66   :  { %464 = vst [vmem:[%s2071_s1 + $0x640] sm:$0xff] %v208_v8  ;;  %v211_v11 = vld [vmem:[%s2070_s0 + $0x658] sm:$0xff]  ;;  %465 = vst [vmem:[%s2071_s1 + $0x648] sm:$0xff] %v209_v9  ;;  %v212_v12 = vld [vmem:[%s2070_s0 + $0x660] sm:$0xff] }
  0x67   :  { %466 = vst [vmem:[%s2071_s1 + $0x650] sm:$0xff] %v210_v10  ;;  %467 = vst [vmem:[%s2071_s1 + $0x658] sm:$0xff] %v211_v11  ;;  %v213_v13 = vld [vmem:[%s2070_s0 + $0x668] sm:$0xff]  ;;  %v214_v14 = vld [vmem:[%s2070_s0 + $0x670] sm:$0xff] }
  0x68   :  { %468 = vst [vmem:[%s2071_s1 + $0x660] sm:$0xff] %v212_v12  ;;  %469 = vst [vmem:[%s2071_s1 + $0x668] sm:$0xff] %v213_v13  ;;  %v215_v15 = vld [vmem:[%s2070_s0 + $0x678] sm:$0xff]  ;;  %v216_v16 = vld [vmem:[%s2070_s0 + $0x680] sm:$0xff] }
  0x69   :  { %470 = vst [vmem:[%s2071_s1 + $0x670] sm:$0xff] %v214_v14  ;;  %v217_v17 = vld [vmem:[%s2070_s0 + $0x688] sm:$0xff]  ;;  %471 = vst [vmem:[%s2071_s1 + $0x678] sm:$0xff] %v215_v15  ;;  %v218_v18 = vld [vmem:[%s2070_s0 + $0x690] sm:$0xff] }
  0x6a   :  { %472 = vst [vmem:[%s2071_s1 + $0x680] sm:$0xff] %v216_v16  ;;  %473 = vst [vmem:[%s2071_s1 + $0x688] sm:$0xff] %v217_v17  ;;  %v219_v19 = vld [vmem:[%s2070_s0 + $0x698] sm:$0xff]  ;;  %v220_v20 = vld [vmem:[%s2070_s0 + $0x6a0] sm:$0xff] }
  0x6b   :  { %474 = vst [vmem:[%s2071_s1 + $0x690] sm:$0xff] %v218_v18  ;;  %475 = vst [vmem:[%s2071_s1 + $0x698] sm:$0xff] %v219_v19  ;;  %v221_v21 = vld [vmem:[%s2070_s0 + $0x6a8] sm:$0xff]  ;;  %v222_v22 = vld [vmem:[%s2070_s0 + $0x6b0] sm:$0xff] }
  0x6c   :  { %476 = vst [vmem:[%s2071_s1 + $0x6a0] sm:$0xff] %v220_v20  ;;  %v223_v23 = vld [vmem:[%s2070_s0 + $0x6b8] sm:$0xff]  ;;  %477 = vst [vmem:[%s2071_s1 + $0x6a8] sm:$0xff] %v221_v21  ;;  %v224_v24 = vld [vmem:[%s2070_s0 + $0x6c0] sm:$0xff] }
  0x6d   :  { %478 = vst [vmem:[%s2071_s1 + $0x6b0] sm:$0xff] %v222_v22  ;;  %479 = vst [vmem:[%s2071_s1 + $0x6b8] sm:$0xff] %v223_v23  ;;  %v225_v25 = vld [vmem:[%s2070_s0 + $0x6c8] sm:$0xff]  ;;  %v226_v26 = vld [vmem:[%s2070_s0 + $0x6d0] sm:$0xff] }
  0x6e   :  { %480 = vst [vmem:[%s2071_s1 + $0x6c0] sm:$0xff] %v224_v24  ;;  %481 = vst [vmem:[%s2071_s1 + $0x6c8] sm:$0xff] %v225_v25  ;;  %v227_v27 = vld [vmem:[%s2070_s0 + $0x6d8] sm:$0xff]  ;;  %v228_v28 = vld [vmem:[%s2070_s0 + $0x6e0] sm:$0xff] }
  0x6f   :  { %482 = vst [vmem:[%s2071_s1 + $0x6d0] sm:$0xff] %v226_v26  ;;  %v229_v29 = vld [vmem:[%s2070_s0 + $0x6e8] sm:$0xff]  ;;  %483 = vst [vmem:[%s2071_s1 + $0x6d8] sm:$0xff] %v227_v27  ;;  %v230_v30 = vld [vmem:[%s2070_s0 + $0x6f0] sm:$0xff] }
  0x70   :  { %484 = vst [vmem:[%s2071_s1 + $0x6e0] sm:$0xff] %v228_v28  ;;  %485 = vst [vmem:[%s2071_s1 + $0x6e8] sm:$0xff] %v229_v29  ;;  %v231_v31 = vld [vmem:[%s2070_s0 + $0x6f8] sm:$0xff]  ;;  %v232_v32 = vld [vmem:[%s2070_s0 + $0x700] sm:$0xff] }
  0x71   :  { %486 = vst [vmem:[%s2071_s1 + $0x6f0] sm:$0xff] %v230_v30  ;;  %487 = vst [vmem:[%s2071_s1 + $0x6f8] sm:$0xff] %v231_v31  ;;  %v233_v33 = vld [vmem:[%s2070_s0 + $0x708] sm:$0xff]  ;;  %v234_v34 = vld [vmem:[%s2070_s0 + $0x710] sm:$0xff] }
  0x72   :  { %488 = vst [vmem:[%s2071_s1 + $0x700] sm:$0xff] %v232_v32  ;;  %v235_v35 = vld [vmem:[%s2070_s0 + $0x718] sm:$0xff]  ;;  %489 = vst [vmem:[%s2071_s1 + $0x708] sm:$0xff] %v233_v33  ;;  %v236_v36 = vld [vmem:[%s2070_s0 + $0x720] sm:$0xff] }
  0x73   :  { %490 = vst [vmem:[%s2071_s1 + $0x710] sm:$0xff] %v234_v34  ;;  %491 = vst [vmem:[%s2071_s1 + $0x718] sm:$0xff] %v235_v35  ;;  %v237_v37 = vld [vmem:[%s2070_s0 + $0x728] sm:$0xff]  ;;  %v238_v38 = vld [vmem:[%s2070_s0 + $0x730] sm:$0xff] }
  0x74   :  { %492 = vst [vmem:[%s2071_s1 + $0x720] sm:$0xff] %v236_v36  ;;  %493 = vst [vmem:[%s2071_s1 + $0x728] sm:$0xff] %v237_v37  ;;  %v239_v39 = vld [vmem:[%s2070_s0 + $0x738] sm:$0xff]  ;;  %v240_v40 = vld [vmem:[%s2070_s0 + $0x740] sm:$0xff] }
  0x75   :  { %494 = vst [vmem:[%s2071_s1 + $0x730] sm:$0xff] %v238_v38  ;;  %v241_v41 = vld [vmem:[%s2070_s0 + $0x748] sm:$0xff]  ;;  %495 = vst [vmem:[%s2071_s1 + $0x738] sm:$0xff] %v239_v39  ;;  %v242_v42 = vld [vmem:[%s2070_s0 + $0x750] sm:$0xff] }
  0x76   :  { %496 = vst [vmem:[%s2071_s1 + $0x740] sm:$0xff] %v240_v40  ;;  %497 = vst [vmem:[%s2071_s1 + $0x748] sm:$0xff] %v241_v41  ;;  %v243_v43 = vld [vmem:[%s2070_s0 + $0x758] sm:$0xff]  ;;  %v244_v44 = vld [vmem:[%s2070_s0 + $0x760] sm:$0xff] }
  0x77   :  { %498 = vst [vmem:[%s2071_s1 + $0x750] sm:$0xff] %v242_v42  ;;  %499 = vst [vmem:[%s2071_s1 + $0x758] sm:$0xff] %v243_v43  ;;  %v245_v45 = vld [vmem:[%s2070_s0 + $0x768] sm:$0xff]  ;;  %v246_v46 = vld [vmem:[%s2070_s0 + $0x770] sm:$0xff] }
  0x78   :  { %500 = vst [vmem:[%s2071_s1 + $0x760] sm:$0xff] %v244_v44  ;;  %v247_v47 = vld [vmem:[%s2070_s0 + $0x778] sm:$0xff]  ;;  %501 = vst [vmem:[%s2071_s1 + $0x768] sm:$0xff] %v245_v45  ;;  %v248_v48 = vld [vmem:[%s2070_s0 + $0x780] sm:$0xff] }
  0x79   :  { %502 = vst [vmem:[%s2071_s1 + $0x770] sm:$0xff] %v246_v46  ;;  %503 = vst [vmem:[%s2071_s1 + $0x778] sm:$0xff] %v247_v47  ;;  %v249_v49 = vld [vmem:[%s2070_s0 + $0x788] sm:$0xff]  ;;  %v250_v50 = vld [vmem:[%s2070_s0 + $0x790] sm:$0xff] }
  0x7a   :  { %504 = vst [vmem:[%s2071_s1 + $0x780] sm:$0xff] %v248_v48  ;;  %505 = vst [vmem:[%s2071_s1 + $0x788] sm:$0xff] %v249_v49  ;;  %v251_v51 = vld [vmem:[%s2070_s0 + $0x798] sm:$0xff]  ;;  %v252_v52 = vld [vmem:[%s2070_s0 + $0x7a0] sm:$0xff] }
  0x7b   :  { %506 = vst [vmem:[%s2071_s1 + $0x790] sm:$0xff] %v250_v50  ;;  %v253_v53 = vld [vmem:[%s2070_s0 + $0x7a8] sm:$0xff]  ;;  %507 = vst [vmem:[%s2071_s1 + $0x798] sm:$0xff] %v251_v51  ;;  %v254_v54 = vld [vmem:[%s2070_s0 + $0x7b0] sm:$0xff] }
  0x7c   :  { %508 = vst [vmem:[%s2071_s1 + $0x7a0] sm:$0xff] %v252_v52  ;;  %509 = vst [vmem:[%s2071_s1 + $0x7a8] sm:$0xff] %v253_v53  ;;  %v255_v55 = vld [vmem:[%s2070_s0 + $0x7b8] sm:$0xff]  ;;  %v256_v56 = vld [vmem:[%s2070_s0 + $0x7c0] sm:$0xff] }
  0x7d   :  { %510 = vst [vmem:[%s2071_s1 + $0x7b0] sm:$0xff] %v254_v54  ;;  %511 = vst [vmem:[%s2071_s1 + $0x7b8] sm:$0xff] %v255_v55  ;;  %v257_v57 = vld [vmem:[%s2070_s0 + $0x7c8] sm:$0xff]  ;;  %v258_v58 = vld [vmem:[%s2070_s0 + $0x7d0] sm:$0xff] }
  0x7e   :  { %512 = vst [vmem:[%s2071_s1 + $0x7c0] sm:$0xff] %v256_v56  ;;  %v259_v59 = vld [vmem:[%s2070_s0 + $0x7d8] sm:$0xff]  ;;  %513 = vst [vmem:[%s2071_s1 + $0x7c8] sm:$0xff] %v257_v57  ;;  %v260_v60 = vld [vmem:[%s2070_s0 + $0x7e0] sm:$0xff] }
  0x7f   :  { %514 = vst [vmem:[%s2071_s1 + $0x7d0] sm:$0xff] %v258_v58  ;;  %515 = vst [vmem:[%s2071_s1 + $0x7d8] sm:$0xff] %v259_v59  ;;  %v261_v61 = vld [vmem:[%s2070_s0 + $0x7e8] sm:$0xff]  ;;  %v262_v62 = vld [vmem:[%s2070_s0 + $0x7f0] sm:$0xff] }
  0x80   :  { %516 = vst [vmem:[%s2071_s1 + $0x7e0] sm:$0xff] %v260_v60  ;;  %517 = vst [vmem:[%s2071_s1 + $0x7e8] sm:$0xff] %v261_v61  ;;  %v263_v63 = vld [vmem:[%s2070_s0 + $0x7f8] sm:$0xff] }
  0x81   :  { %518 = vst [vmem:[%s2071_s1 + $0x7f0] sm:$0xff] %v262_v62  ;;  %519 = vst [vmem:[%s2071_s1 + $0x7f8] sm:$0xff] %v263_v63 }

</bundles_post_ra>
